<compile_context>
chip_gen: v5e
topology: v5e:2x2
jax: 0.10.0
libtpu: 0.0.40
codegen_flags: <defaults>
</compile_context>

<pallas_src>
import jax
import jax.numpy as jnp
from jax.experimental import pallas as pl
from jax.experimental.pallas import tpu as pltpu

LANE = 128
SUBLANE_BF16 = 16  # bf16 packs two rows per 32-bit sublane


def _round_up(x, m):
    return ((x + m - 1) // m) * m


def _pick_batch_tile(B, block_b):
    # Batch tiles are multiples of 16 (bf16 sublane packing).
    tb = max(SUBLANE_BF16, min(block_b, _round_up(B, SUBLANE_BF16)))
    # If a single tile would hold a large batch, split into two tiles so the
    # "parallel" grid axis gives v7x's second TensorCore a step to run
    # (one extra ~0.35 us grid step is negligible on single-core v5e/v6e).
    if tb >= B and B >= 512:
        tb = _round_up((B + 1) // 2, 256)
    return tb


def _textfnn_kernel(x_ref, w1_ref, b1_ref, w2_ref, b2_ref, w3_ref, b3_ref, o_ref):
    cdt = w1_ref.dtype  # bf16 compute dtype for MXU operands
    # Cast x f32 -> bf16 inside the kernel (avoids a host-side pad/cast pass).
    x = x_ref[...].astype(cdt)
    # Layer 1: bf16 MXU matmul, f32 accumulate; bias add + ReLU in f32 (VPU).
    h = jnp.dot(x, w1_ref[...], preferred_element_type=jnp.float32)
    h = jnp.maximum(h + b1_ref[...], 0.0)
    # Layer 2: Linear + ReLU.
    h = jnp.dot(h.astype(cdt), w2_ref[...], preferred_element_type=jnp.float32)
    h = jnp.maximum(h + b2_ref[...], 0.0)
    # Layer 3: Linear (logits, no activation).
    out = jnp.dot(h.astype(cdt), w3_ref[...], preferred_element_type=jnp.float32)
    o_ref[...] = (out + b3_ref[...]).astype(o_ref.dtype)


def textfnn_forward(x, w1, b1, w2, b2, w3, b3, *, block_b=1024,
                    compute_dtype=jnp.bfloat16):
    """x: (B, input_size) f32; w*: (in, out) f32; b*: (1, out) f32.
    Returns f32 logits of shape (B, num_classes)."""
    B, in_size = x.shape
    hidden = w1.shape[1]
    num_classes = w3.shape[1]

    # Lane-align hidden / output feature dims (multiples of 128). The input
    # feature dim stays unpadded (full-dim blocks are exempt from the rule).
    hid_p = _round_up(hidden, LANE)
    out_p = _round_up(num_classes, LANE)

    tb = _pick_batch_tile(B, block_b)
    grid = (pl.cdiv(B, tb),)  # last tile may be partial: OOB rows are dropped

    def pad_cast(a, rows, cols, dtype):
        a = a.astype(dtype)
        pr, pc = rows - a.shape[0], cols - a.shape[1]
        if pr or pc:
            a = jnp.pad(a, ((0, pr), (0, pc)))
        return a

    # Weights: bf16 MXU operands; zero padding is exact through ReLU.
    w1p = pad_cast(w1, in_size, hid_p, compute_dtype)
    w2p = pad_cast(w2, hid_p, hid_p, compute_dtype)
    w3p = pad_cast(w3, hid_p, out_p, compute_dtype)
    # Biases stay f32 (epilogue runs in f32 on the VPU).
    b1p = pad_cast(b1, 1, hid_p, jnp.float32)
    b2p = pad_cast(b2, 1, hid_p, jnp.float32)
    b3p = pad_cast(b3, 1, out_p, jnp.float32)

    # Resident operands: constant index_map -> DMA'd once; single-buffered to
    # avoid doubling the weight VMEM footprint.
    def resident(shape):
        return pl.BlockSpec(shape, lambda i: (0, 0), pipeline_mode=pl.Buffered(1))

    weight_bytes = sum(a.size * a.dtype.itemsize
                       for a in (w1p, w2p, w3p, b1p, b2p, b3p))
    x_tile_bytes = tb * in_size * x.dtype.itemsize
    out_tile_bytes = tb * out_p * 4
    interm_bytes = tb * hid_p * (4 + 4 + 2) + tb * in_size * 2  # f32 h + bf16 copies
    vmem_needed = weight_bytes + 2 * (x_tile_bytes + out_tile_bytes) + interm_bytes
    vmem_limit = int(min(max(vmem_needed * 13 // 10 + (1 << 20), 32 << 20), 128 << 20))

    flops = 2 * B * (in_size * hid_p + hid_p * hid_p + hid_p * out_p)
    bytes_accessed = (x.size * x.dtype.itemsize + weight_bytes + B * out_p * 4)

    out_padded = pl.pallas_call(
        _textfnn_kernel,
        out_shape=jax.ShapeDtypeStruct((B, out_p), jnp.float32),
        grid=grid,
        in_specs=[
            pl.BlockSpec((tb, in_size), lambda i: (i, 0)),  # x: tiled over batch
            resident((in_size, hid_p)),                     # w1 (VMEM-resident)
            resident((1, hid_p)),                           # b1
            resident((hid_p, hid_p)),                       # w2
            resident((1, hid_p)),                           # b2
            resident((hid_p, out_p)),                       # w3
            resident((1, out_p)),                           # b3
        ],
        out_specs=pl.BlockSpec((tb, out_p), lambda i: (i, 0)),
        compiler_params=pltpu.CompilerParams(
            dimension_semantics=("parallel",),
            vmem_limit_bytes=vmem_limit),
        cost_estimate=pl.CostEstimate(
            flops=flops, transcendentals=0, bytes_accessed=bytes_accessed),
    )(x, w1p, b1p, w2p, b2p, w3p, b3p)

    if out_p == num_classes:
        return out_padded
    return out_padded[:, :num_classes]


def init_params(key, input_size, hidden_size, num_classes):
    """Deterministic init mimicking nn.Linear default (uniform +-1/sqrt(fan_in)).
    Weights stored as (in_features, out_features)."""
    ks = jax.random.split(key, 6)

    def linear(kw, kb, fan_in, fan_out):
        bound = 1.0 / jnp.sqrt(jnp.float32(fan_in))
        w = jax.random.uniform(kw, (fan_in, fan_out), jnp.float32, -bound, bound)
        b = jax.random.uniform(kb, (1, fan_out), jnp.float32, -bound, bound)
        return w, b

    w1, b1 = linear(ks[0], ks[1], input_size, hidden_size)
    w2, b2 = linear(ks[2], ks[3], hidden_size, hidden_size)
    w3, b3 = linear(ks[4], ks[5], hidden_size, num_classes)
    return w1, b1, w2, b2, w3, b3


if __name__ == "__main__":
    key = jax.random.PRNGKey(0)
    k_x, k_p = jax.random.split(key)

    batch, input_size, hidden_size, num_classes = 8, 64, 32, 8
    x = jax.random.normal(k_x, (batch, input_size), jnp.float32)
    params = init_params(k_p, input_size, hidden_size, num_classes)

    out = jax.block_until_ready(textfnn_forward(x, *params))
    assert out.shape == (batch, num_classes)

    w1, b1, w2, b2, w3, b3 = params

    # Reference with identical bf16-operand / f32-accumulate math (tight check).
    cdt = jnp.bfloat16
    h = jnp.maximum(jnp.dot(x.astype(cdt), w1.astype(cdt),
                            preferred_element_type=jnp.float32) + b1, 0.0)
    h = jnp.maximum(jnp.dot(h.astype(cdt), w2.astype(cdt),
                            preferred_element_type=jnp.float32) + b2, 0.0)
    ref_bf16 = jnp.dot(h.astype(cdt), w3.astype(cdt),
                       preferred_element_type=jnp.float32) + b3
    assert jnp.allclose(out, ref_bf16, atol=2e-3, rtol=2e-3)

    # Sanity check against pure-f32 PyTorch semantics (loose tolerance absorbs
    # bf16 operand rounding; strict f32 parity would need f32 MXU operands).
    ref32 = jnp.maximum(x @ w1 + b1, 0.0)
    ref32 = jnp.maximum(ref32 @ w2 + b2, 0.0)
    ref32 = ref32 @ w3 + b3
    assert jnp.allclose(out, ref32, atol=5e-2, rtol=5e-2)

    print("KERNEL_OK")
</pallas_src>

<mosaic_0001>
module attributes {stable_mosaic.version = 11 : i64} {
  func.func @_textfnn_kernel(%arg0: i32, %arg1: memref<16x64xf32, #tpu.memory_space<vmem>>, %arg2: memref<64x128xbf16, #tpu.memory_space<vmem>>, %arg3: memref<1x128xf32, #tpu.memory_space<vmem>>, %arg4: memref<128x128xbf16, #tpu.memory_space<vmem>>, %arg5: memref<1x128xf32, #tpu.memory_space<vmem>>, %arg6: memref<128x128xbf16, #tpu.memory_space<vmem>>, %arg7: memref<1x128xf32, #tpu.memory_space<vmem>>, %arg8: memref<16x128xf32, #tpu.memory_space<vmem>>) attributes {dimension_semantics = [#tpu.dimension_semantics<parallel>], iteration_bounds = array<i64: 1>, scalar_prefetch = 0 : i64, scratch_operands = 0 : i64, tpu.core_type = #tpu.core_type<tc>, window_params = [{transform_indices = @transform_0, window_bounds = array<i64: 16, 64>}, {pipeline_mode = #tpu.pipeline_mode<synchronous>, transform_indices = @transform_1, window_bounds = array<i64: 64, 128>}, {pipeline_mode = #tpu.pipeline_mode<synchronous>, transform_indices = @transform_2, window_bounds = array<i64: 1, 128>}, {pipeline_mode = #tpu.pipeline_mode<synchronous>, transform_indices = @transform_3, window_bounds = array<i64: 128, 128>}, {pipeline_mode = #tpu.pipeline_mode<synchronous>, transform_indices = @transform_4, window_bounds = array<i64: 1, 128>}, {pipeline_mode = #tpu.pipeline_mode<synchronous>, transform_indices = @transform_5, window_bounds = array<i64: 128, 128>}, {pipeline_mode = #tpu.pipeline_mode<synchronous>, transform_indices = @transform_6, window_bounds = array<i64: 1, 128>}, {transform_indices = @transform_7, window_bounds = array<i64: 16, 128>}]} {
    %c0 = arith.constant 0 : index
    %c0_0 = arith.constant 0 : index
    %0 = vector.load %arg1[%c0, %c0_0] : memref<16x64xf32, #tpu.memory_space<vmem>>, vector<16x64xf32>
    %1 = arith.truncf %0 : vector<16x64xf32> to vector<16x64xbf16>
    %c0_1 = arith.constant 0 : index
    %c0_2 = arith.constant 0 : index
    %2 = vector.load %arg2[%c0_1, %c0_2] : memref<64x128xbf16, #tpu.memory_space<vmem>>, vector<64x128xbf16>
    %cst = arith.constant dense<0.000000e+00> : vector<16x128xf32>
    %3 = tpu.matmul %1, %2, %cst {dimension_numbers = #tpu.dot_dimension_numbers<[1], [0], [0], [1], [0, 0, 1, 1], [], []>} : vector<16x64xbf16>, vector<64x128xbf16>, vector<16x128xf32> -> vector<16x128xf32>
    %c0_3 = arith.constant 0 : index
    %c0_4 = arith.constant 0 : index
    %4 = vector.load %arg3[%c0_3, %c0_4] : memref<1x128xf32, #tpu.memory_space<vmem>>, vector<1x128xf32>
    %5 = vector.broadcast %4 : vector<1x128xf32> to vector<16x128xf32>
    %6 = arith.addf %3, %5 : vector<16x128xf32>
    %cst_5 = arith.constant 0.000000e+00 : f32
    %7 = vector.broadcast %cst_5 : f32 to vector<16x128xf32>
    %8 = arith.maximumf %6, %7 : vector<16x128xf32>
    %9 = arith.truncf %8 : vector<16x128xf32> to vector<16x128xbf16>
    %c0_6 = arith.constant 0 : index
    %c0_7 = arith.constant 0 : index
    %10 = vector.load %arg4[%c0_6, %c0_7] : memref<128x128xbf16, #tpu.memory_space<vmem>>, vector<128x128xbf16>
    %cst_8 = arith.constant dense<0.000000e+00> : vector<16x128xf32>
    %11 = tpu.matmul %9, %10, %cst_8 {dimension_numbers = #tpu.dot_dimension_numbers<[1], [0], [0], [1], [0, 0, 1, 1], [], []>} : vector<16x128xbf16>, vector<128x128xbf16>, vector<16x128xf32> -> vector<16x128xf32>
    %c0_9 = arith.constant 0 : index
    %c0_10 = arith.constant 0 : index
    %12 = vector.load %arg5[%c0_9, %c0_10] : memref<1x128xf32, #tpu.memory_space<vmem>>, vector<1x128xf32>
    %13 = vector.broadcast %12 : vector<1x128xf32> to vector<16x128xf32>
    %14 = arith.addf %11, %13 : vector<16x128xf32>
    %cst_11 = arith.constant 0.000000e+00 : f32
    %15 = vector.broadcast %cst_11 : f32 to vector<16x128xf32>
    %16 = arith.maximumf %14, %15 : vector<16x128xf32>
    %17 = arith.truncf %16 : vector<16x128xf32> to vector<16x128xbf16>
    %c0_12 = arith.constant 0 : index
    %c0_13 = arith.constant 0 : index
    %18 = vector.load %arg6[%c0_12, %c0_13] : memref<128x128xbf16, #tpu.memory_space<vmem>>, vector<128x128xbf16>
    %cst_14 = arith.constant dense<0.000000e+00> : vector<16x128xf32>
    %19 = tpu.matmul %17, %18, %cst_14 {dimension_numbers = #tpu.dot_dimension_numbers<[1], [0], [0], [1], [0, 0, 1, 1], [], []>} : vector<16x128xbf16>, vector<128x128xbf16>, vector<16x128xf32> -> vector<16x128xf32>
    %c0_15 = arith.constant 0 : index
    %c0_16 = arith.constant 0 : index
    %20 = vector.load %arg7[%c0_15, %c0_16] : memref<1x128xf32, #tpu.memory_space<vmem>>, vector<1x128xf32>
    %21 = vector.broadcast %20 : vector<1x128xf32> to vector<16x128xf32>
    %22 = arith.addf %19, %21 : vector<16x128xf32>
    %c0_17 = arith.constant 0 : index
    %c0_18 = arith.constant 0 : index
    %23 = vector.load %arg8[%c0_17, %c0_18] : memref<16x128xf32, #tpu.memory_space<vmem>>, vector<16x128xf32>
    tpu.vector_store %arg8[%c0_17, %c0_18], %22 {strides = array<i32>} : memref<16x128xf32, #tpu.memory_space<vmem>>, vector<16x128xf32>,
    return
  }
  func.func @transform_0(%arg0: i32) -> (i32, i32) {
    %c0_i32 = arith.constant 0 : i32
    %c0_i32_0 = arith.constant 0 : i32
    return %arg0, %c0_i32 : i32, i32
  }
  func.func @transform_1(%arg0: i32) -> (i32, i32) {
    %c0_i32 = arith.constant 0 : i32
    %c0_i32_0 = arith.constant 0 : i32
    %c0_i32_1 = arith.constant 0 : i32
    return %c0_i32, %c0_i32_0 : i32, i32
  }
  func.func @transform_2(%arg0: i32) -> (i32, i32) {
    %c0_i32 = arith.constant 0 : i32
    %c0_i32_0 = arith.constant 0 : i32
    %c0_i32_1 = arith.constant 0 : i32
    return %c0_i32, %c0_i32_0 : i32, i32
  }
  func.func @transform_3(%arg0: i32) -> (i32, i32) {
    %c0_i32 = arith.constant 0 : i32
    %c0_i32_0 = arith.constant 0 : i32
    %c0_i32_1 = arith.constant 0 : i32
    return %c0_i32, %c0_i32_0 : i32, i32
  }
  func.func @transform_4(%arg0: i32) -> (i32, i32) {
    %c0_i32 = arith.constant 0 : i32
    %c0_i32_0 = arith.constant 0 : i32
    %c0_i32_1 = arith.constant 0 : i32
    return %c0_i32, %c0_i32_0 : i32, i32
  }
  func.func @transform_5(%arg0: i32) -> (i32, i32) {
    %c0_i32 = arith.constant 0 : i32
    %c0_i32_0 = arith.constant 0 : i32
    %c0_i32_1 = arith.constant 0 : i32
    return %c0_i32, %c0_i32_0 : i32, i32
  }
  func.func @transform_6(%arg0: i32) -> (i32, i32) {
    %c0_i32 = arith.constant 0 : i32
    %c0_i32_0 = arith.constant 0 : i32
    %c0_i32_1 = arith.constant 0 : i32
    return %c0_i32, %c0_i32_0 : i32, i32
  }
  func.func @transform_7(%arg0: i32) -> (i32, i32) {
    %c0_i32 = arith.constant 0 : i32
    %c0_i32_0 = arith.constant 0 : i32
    return %arg0, %c0_i32 : i32, i32
  }
}

</mosaic_0001>

<bundles_post_ra>
// kernel: tpu_custom_call.1
= control target key start
LH: loop header
LB: loop body
LE: loop exit
PB: predicated region body
PF: predicated region fallthrough
CT: control target
= control target key end

     0   :  { %12 = vsyncpa [#allocation3], 0  ;;  %s661_s0 = inlined_call_operand.hbm [shape: f32[8,64], index: 0, kind: input, shape index: {}]   ;;  %s662_s1 = inlined_call_operand.hbm [shape: bf16[64,128], index: 1, kind: input, shape index: {}]   ;;  %s663_s2 = inlined_call_operand.vmem [shape: f32[1,128], index: 2, kind: input, shape index: {}]   ;;  %s664_s3 = inlined_call_operand.hbm [shape: bf16[128,128], index: 3, kind: input, shape index: {}]   ;;  %s665_s4 = inlined_call_operand.vmem [shape: f32[1,128], index: 4, kind: input, shape index: {}]   ;;  %s666_s5 = inlined_call_operand.hbm [shape: bf16[128,128], index: 5, kind: input, shape index: {}]   ;;  %s667_s6 = inlined_call_operand.vmem [shape: f32[1,128], index: 6, kind: input, shape index: {}]   ;;  %s668_s7 = inlined_call_operand.hbm [shape: f32[8,128], index: 7, kind: output, shape index: {}]  }
   0x1   :  { %13 = vsyncpa [#allocation6], 0 }
   0x2   :  { %14 = vsyncpa [#allocation9], 0 }
   0x3   :  { %15 = vsyncpa [#allocation4], 0  ;;  %s33_s26 = sshll.u32 %s662_s1, 4  ;;  %s34_s26 = int_to_ptr.hbm [resolvable:$true] %s33_s26 }
   0x4   :  { %19 = vsyncadd [#allocation3], 128  ;;  %s582_s27 = smov [#allocation5]   ;;  %s20_s8 = sshll.u32 %s661_s0, 4  ;;  %s21_s8 = int_to_ptr.hbm [resolvable:$true] %s20_s8 }
   0x5   :  { %s35_s28 = sshll.u32 %s582_s27, 4  ;;  %s583_s9 = smov 64   ;;  %s36_s28 = int_to_ptr.vmem [resolvable:$true] %s35_s28 }
   0x6   :  { %s584_s10 = smov 4   ;;  %s585_s11 = smov [#allocation2]  }
   0x7   :  { %41 = dma.hbm_to_vmem [thread:$0]  %s34_s26, 512, %s36_s28, [#allocation6], %s583_s9, %s583_s9, %s584_s10  }
   0x8   :  { %s22_s12 = sshll.u32 %s585_s11, 4  ;;  %s586_s13 = smov 128   ;;  %s23_s12 = int_to_ptr.vmem [resolvable:$true] %s22_s12 }
   0x9   :  { %s587_s14 = smov 8   ;;  %s48_s16 = sshll.u32 %s664_s3, 4  ;;  %s49_s16 = int_to_ptr.hbm [resolvable:$true] %s48_s16 }
   0xa   :  { %28 = dma.hbm_to_vmem [thread:$0]  %s21_s8, 128, %s23_s12, [#allocation3], %s586_s13, %s586_s13, %s587_s14  }
   0xb   :  { %s588_s17 = smov [#allocation7]   ;;  %s63_s20 = sshll.u32 %s666_s5, 4  ;;  %s64_s20 = int_to_ptr.hbm [resolvable:$true] %s63_s20 }
   0xc   :  { %s50_s0 = sshll.u32 %s588_s17, 4  ;;  %s589_s21 = smov [#allocation8]   ;;  %s51_s0 = int_to_ptr.vmem [resolvable:$true] %s50_s0 }
   0xd   :  { %56 = dma.hbm_to_vmem [thread:$0]  %s49_s16, 1024, %s51_s0, [#allocation6], %s583_s9, %s583_s9, %s584_s10  }
   0xe   :  { %s65_s22 = sshll.u32 %s589_s21, 4  ;;  %s66_s22 = int_to_ptr.vmem [resolvable:$true] %s65_s22 }
   0xf   :  { %71 = dma.hbm_to_vmem [thread:$0]  %s64_s20, 1024, %s66_s22, [#allocation9], %s583_s9, %s583_s9, %s584_s10  }
  0x10   :  { %574 = dma.done.wait [#allocation3], 256  }
  0x11   :  { %575 = vsyncadd [#allocation3], 4294967040 }
  0x12   :  { %576 = dma.done.wait [#allocation6], 1536  }
  0x13   :  { %577 = vsyncadd [#allocation6], 4294965760 }
  0x14   :  { %578 = dma.done.wait [#allocation9], 1024  }
  0x15   :  { %579 = vsyncadd [#allocation9], 4294966272  ;;  %v425_v0 = vld [vmem:[#allocation5 + $0x18] sm:$0xff]  ;;  %v424_v1 = vld [vmem:[#allocation5 + $0x10] sm:$0xff]  ;;  %vm130_vm0 = vcmask 523264  }
  0x16   :  { %138 = vmatpush.bf16.msra.mxu0 %v425_v0  ;;  %v433_v2 = vld [vmem:[#allocation7 + $0x38] sm:$0xff]  ;;  %v432_v3 = vld [vmem:[#allocation7 + $0x30] sm:$0xff]  ;;  %v423_v4 = vld [vmem:[#allocation5 + $0x8] sm:$0xff] }
  0x17   :  { %219 = vmatpush.bf16.msra.mxu1 %v433_v2  ;;  %v431_v5 = vld [vmem:[#allocation7 + $0x28] sm:$0xff]  ;;  %v422_v6 = vld [vmem:[#allocation5] sm:$0xff]  ;;  %v91_v7 = vld [vmem:[#allocation2] sm:$0xff] }
  0x18   :  { %v92_v8 = vld [vmem:[#allocation2 + $0x8] sm:$0xff]  ;;  %v430_v9 = vld [vmem:[#allocation7 + $0x20] sm:$0xff]  ;;  %v428_v12 = vld [vmem:[#allocation7 + $0x10] sm:$0xff] }
  0x19   :  { %v93_v10 = vpack.c.bf16 %v92_v8, %v91_v7  ;;  %v429_v11 = vld [vmem:[#allocation7 + $0x18] sm:$0xff]  ;;  %v427_v13 = vld [vmem:[#allocation7 + $0x8] sm:$0xff]  ;;  %v426_v14 = vld [vmem:[#allocation7] sm:$0xff] }
  0x1a   :  { %139 = vmatpush.bf16.msra.mxu0 %v424_v1  ;;  %v441_v15 = vld [vmem:[#allocation8 + $0x38] sm:$0xff]  ;;  %v440_v16 = vld [vmem:[#allocation8 + $0x30] sm:$0xff]  ;;  %v439_v17 = vld [vmem:[#allocation8 + $0x28] sm:$0xff] }
  0x1b   :  { %220 = vmatpush.bf16.msra.mxu1 %v432_v3  ;;  %304 = vmatpush.bf16.msra.mxu2 %v441_v15  ;;  %v438_v18 = vld [vmem:[#allocation8 + $0x20] sm:$0xff]  ;;  %v451_v20 = vld [vmem:[%s663_s2] ss:$0 sm:$0xff]  ;;  %v437_v27 = vld [vmem:[#allocation8 + $0x18] sm:$0xff] }
  0x1c   :  { %v436_v28 = vld [vmem:[#allocation8 + $0x10] sm:$0xff]  ;;  %v435_v29 = vld [vmem:[#allocation8 + $0x8] sm:$0xff]  ;;  %v434_v30 = vld [vmem:[#allocation8] sm:$0xff] }
  0x1d   :  { %v452_v32 = vld [vmem:[%s665_s4] ss:$0 sm:$0xff] }
  0x1e   :  { %140 = vmatpush.bf16.msra.mxu0 %v423_v4  ;;  %v453_v39 = vld [vmem:[%s667_s6] ss:$0 sm:$0xff] }
  0x1f   :  { %221 = vmatpush.bf16.msra.mxu1 %v431_v5  ;;  %305 = vmatpush.bf16.msra.mxu2 %v440_v16 }
  0x22   :  { %141 = vmatpush.bf16.msra.mxu0 %v422_v6 }
  0x23   :  { %222 = vmatpush.bf16.msra.mxu1 %v430_v9  ;;  %306 = vmatpush.bf16.msra.mxu2 %v439_v17 }
  0x25   :  { %357 = vmatmul.msk.bf16.vlgmr.msra.gmra.mxu0 %vm130_vm0, %v93_v10 }
  0x27   :  { %223 = vmatpush.bf16.msra.mxu1 %v429_v11  ;;  %307 = vmatpush.bf16.msra.mxu2 %v438_v18 }
  0x2b   :  { %224 = vmatpush.bf16.msra.mxu1 %v428_v12  ;;  %308 = vmatpush.bf16.msra.mxu2 %v437_v27 }
  0x2f   :  { %225 = vmatpush.bf16.msra.mxu1 %v427_v13  ;;  %309 = vmatpush.bf16.msra.mxu2 %v436_v28 }
  0x33   :  { %226 = vmatpush.bf16.msra.mxu1 %v426_v14  ;;  %310 = vmatpush.bf16.msra.mxu2 %v435_v29 }
  0x37   :  { %311 = vmatpush.bf16.msra.mxu2 %v434_v30 }
  0xa2   :  { %v143_v19 = vpop.f32.mrf.mxu0 }
  0xa3   :  { %v144_v21 = vadd.f32 %v451_v20, %v143_v19 }
  0xa5   :  { %v148_v24 = vmax.f32 %v144_v21, 0.0 }
  0xaa   :  { %v145_v22 = vpop.f32.mrf.mxu0 }
  0xab   :  { %v146_v23 = vadd.f32 %v451_v20, %v145_v22 }
  0xad   :  { %v149_v25 = vmax.f32 %v146_v23, 0.0 }
  0xaf   :  { %v150_v26 = vpack.c.bf16 %v149_v25, %v148_v24 }
  0xb1   :  { %227 = vmatmul.bf16.vlgmr.msra.gmra.mxu1 %v150_v26 }
 0x12e   :  { %v228_v31 = vpop.f32.mrf.mxu1 }
 0x12f   :  { %v229_v33 = vadd.f32 %v452_v32, %v228_v31 }
 0x131   :  { %v233_v36 = vmax.f32 %v229_v33, 0.0 }
 0x136   :  { %v230_v34 = vpop.f32.mrf.mxu1 }
 0x137   :  { %v231_v35 = vadd.f32 %v452_v32, %v230_v34 }
 0x139   :  { %v234_v37 = vmax.f32 %v231_v35, 0.0 }
 0x13b   :  { %v235_v38 = vpack.c.bf16 %v234_v37, %v233_v36 }
 0x13d   :  { %312 = vmatmul.bf16.vlgmr.msra.gmra.mxu2 %v235_v38 }
 0x1c0   :  { %v313_v40 = vpop.f32.mrf.mxu2 }
 0x1c1   :  { %v314_v41 = vadd.f32 %v453_v39, %v313_v40 }
 0x1c3   :  { %318 = vst [vmem:[#allocation10] sm:$0xff] %v314_v41 }
 0x1c8   :  { %v315_v42 = vpop.f32.mrf.mxu2 }
 0x1c9   :  { %v316_v43 = vadd.f32 %v453_v39, %v315_v42 }
 0x1cb   :  { %319 = vst [vmem:[#allocation10 + $0x8] sm:$0xff] %v316_v43 }
 0x1cc   :  { %323 = vsyncadd [#allocation4], 128  ;;  %s326_s27 = sshll.u32 %s668_s7, 4  ;;  %s590_s28 = smov [#allocation10]   ;;  %s327_s27 = int_to_ptr.hbm [resolvable:$true] %s326_s27 }
 0x1cd   :  { %s324_s29 = sshll.u32 %s590_s28, 4  ;;  %s325_s29 = int_to_ptr.vmem [resolvable:$true] %s324_s29 }
 0x1ce   :  { %332 = dma.vmem_to_hbm [thread:$0]  %s325_s29, 128, %s327_s27, [#allocation4], %s586_s13, %s586_s13, %s587_s14  }
 0x1cf   :  { %580 = dma.done.wait [#allocation4], 256  }
 0x1d0   :  { %581 = vsyncadd [#allocation4], 4294967040 }
 0x1d1   :  { %337 = vsyncpa [#allocation3], 1 }
 0x1d2   :  { %338 = vsyncpa [#allocation6], 1 }
 0x1d3   :  { %339 = vsyncpa [#allocation9], 1 }
 0x1d4   :  { %340 = vsyncpa [#allocation4], 1 }

</bundles_post_ra>
